<compile_context>
chip_gen: v7x
topology: tpu7x:2x2x1
jax: 0.10.0
libtpu: 0.0.40
codegen_flags: <defaults>
</compile_context>

<pallas_src>
import jax
import jax.numpy as jnp
from jax.experimental import pallas as pl
from jax.experimental.pallas import tpu as pltpu


def _locate_entity_kernel(x_ref, wt_ref, b_ref, out_ref):
    # x_ref: (tm, H) streamed   wt_ref: (H, 2) stationary   b_ref: (1, 2) f32
    # out_ref: (2, tm) lane-dense
    acc = jnp.dot(x_ref[...], wt_ref[...],
                  preferred_element_type=jnp.float32)        # (tm, 2), f32
    acc = acc + b_ref[...]                                   # fused bias add
    # Transpose only the tiny accumulator -> dense (2, tm) 128-lane stores.
    out_ref[...] = acc.T.astype(out_ref.dtype)


def _physical_vmem_bytes():
    """Best-effort query of per-core VMEM; conservative (v7x) fallback."""
    try:
        return int(pltpu.get_tpu_info().vmem_capacity_bytes)
    except Exception:
        return 64 * 1024 * 1024


def _vmem_config():
    """Return (activation_budget_bytes, vmem_limit_bytes) per TPU generation."""
    phys = _physical_vmem_bytes()
    if phys >= 128 * 1024 * 1024:
        # v5e / v6e: 128 MiB physical -> bigger tiles, explicit limit well
        # above the 16/32 MiB default scoped VMEM.
        return 56 * 1024 * 1024, 96 * 1024 * 1024
    # v7x: 64 MiB physical per TC -> leave >= 8 MiB headroom.
    return 28 * 1024 * 1024, 56 * 1024 * 1024


def _choose_tm(M, H, itemsize, vmem_budget_bytes):
    """Largest legal row tile for the double-buffered activation stream."""
    # Dominant VMEM consumer: 2 (double buffer) * tm * H * itemsize bytes.
    max_tm = vmem_budget_bytes // (2 * H * itemsize)
    tm = min(4096, max_tm)
    if M >= 512:
        # Guarantee >= 4 grid steps: double-buffering overlap everywhere and
        # both TensorCores busy on v7x megacore.
        tm = min(tm, M // 4)
    tm = max(128, (tm // 128) * 128)   # 128-aligned: dense out lanes, aligned rows
    if M <= tm:
        return M                       # tiny problem: one full-extent block
    return tm


def locate_entity_forward(sentence_features, w_B, b_B, w_E, b_E, *, tm=None):
    """
    sentence_features: (batch, seq, hidden)  float32 or bfloat16
    w_B, w_E: (hidden,)   (PyTorch Linear weight of shape (1, hidden), squeezed)
    b_B, b_E: ()
    returns: (s_B_scores, s_E_scores), each (batch, seq) float32
    """
    B, S, H = sentence_features.shape
    M = B * S
    x2d = sentence_features.reshape(M, H)
    itemsize = x2d.dtype.itemsize

    vmem_budget, vmem_limit = _vmem_config()
    if tm is None:
        tm = _choose_tm(M, H, itemsize, vmem_budget)

    # Fuse the two Linear(H, 1) layers into one pre-transposed (H, 2) weight
    # (stationary MXU operand), kept in the activation dtype so there is no
    # in-kernel cast traffic.  Bias is a tiny (1, 2) f32 resident block.
    Wt = jnp.stack([w_B, w_E], axis=1).astype(x2d.dtype)      # (H, 2)
    bias = jnp.stack([b_B, b_E]).reshape(1, 2).astype(jnp.float32)

    grid = (pl.cdiv(M, tm),)
    cost = pl.CostEstimate(
        flops=4 * M * H,
        transcendentals=0,
        bytes_accessed=M * H * itemsize + 2 * H * itemsize + 2 * M * 4 + 8,
    )

    out = pl.pallas_call(
        _locate_entity_kernel,
        out_shape=jax.ShapeDtypeStruct((2, M), jnp.float32),
        grid_spec=pltpu.PrefetchScalarGridSpec(
            num_scalar_prefetch=0,
            grid=grid,
            in_specs=[
                pl.BlockSpec((tm, H), lambda i: (i, 0)),   # streamed activation tile
                pl.BlockSpec((H, 2), lambda i: (0, 0)),    # fused weight (resident)
                pl.BlockSpec((1, 2), lambda i: (0, 0)),    # bias (resident)
            ],
            out_specs=pl.BlockSpec((2, tm), lambda i: (0, i)),  # lane-dense output
        ),
        compiler_params=pltpu.CompilerParams(
            dimension_semantics=("parallel",),             # shardable across v7x TCs
            vmem_limit_bytes=vmem_limit,
        ),
        cost_estimate=cost,
    )(x2d, Wt, bias)

    s_B = out[0].reshape(B, S)
    s_E = out[1].reshape(B, S)
    return s_B, s_E


def _reference(sentence_features, w_B, b_B, w_E, b_E):
    x = sentence_features.astype(jnp.float32)
    s_B = jnp.einsum("bsh,h->bs", x, w_B.astype(jnp.float32)) + b_B
    s_E = jnp.einsum("bsh,h->bs", x, w_E.astype(jnp.float32)) + b_E
    return s_B, s_E


if __name__ == "__main__":
    key = jax.random.PRNGKey(0)

    # --- primary test: module-consistent small shapes -----------------------
    batch, seq, hidden = 2, 8, 32
    k_x, k_wb, k_bb, k_we, k_be, k_x2, k_x3 = jax.random.split(key, 7)
    x = jax.random.normal(k_x, (batch, seq, hidden), dtype=jnp.float32)

    bound = 1.0 / jnp.sqrt(hidden)
    w_B = jax.random.uniform(k_wb, (hidden,), minval=-bound, maxval=bound, dtype=jnp.float32)
    b_B = jax.random.uniform(k_bb, (), minval=-bound, maxval=bound, dtype=jnp.float32)
    w_E = jax.random.uniform(k_we, (hidden,), minval=-bound, maxval=bound, dtype=jnp.float32)
    b_E = jax.random.uniform(k_be, (), minval=-bound, maxval=bound, dtype=jnp.float32)

    s_B, s_E = locate_entity_forward(x, w_B, b_B, w_E, b_E)
    jax.block_until_ready((s_B, s_E))

    ref_B, ref_E = _reference(x, w_B, b_B, w_E, b_E)
    assert s_B.shape == (batch, seq) and s_E.shape == (batch, seq)
    assert jnp.allclose(s_B, ref_B, atol=1e-5, rtol=1e-5)
    assert jnp.allclose(s_E, ref_E, atol=1e-5, rtol=1e-5)

    # --- secondary test: M % tm != 0 (partial last block) with tm=128 -------
    b2, s2, h2 = 2, 200, 64           # M = 400 -> grid of 4 with a partial block
    x2 = jax.random.normal(k_x2, (b2, s2, h2), dtype=jnp.float32)
    bound2 = 1.0 / jnp.sqrt(h2)
    w_B2 = jax.random.uniform(k_wb, (h2,), minval=-bound2, maxval=bound2, dtype=jnp.float32)
    w_E2 = jax.random.uniform(k_we, (h2,), minval=-bound2, maxval=bound2, dtype=jnp.float32)

    s_B2, s_E2 = locate_entity_forward(x2, w_B2, b_B, w_E2, b_E, tm=128)
    jax.block_until_ready((s_B2, s_E2))
    ref_B2, ref_E2 = _reference(x2, w_B2, b_B, w_E2, b_E)
    assert jnp.allclose(s_B2, ref_B2, atol=1e-4, rtol=1e-4)
    assert jnp.allclose(s_E2, ref_E2, atol=1e-4, rtol=1e-4)

    # --- tertiary test: bf16 activations, multi-step grid (M=512, H=256) ----
    b3, s3, h3 = 2, 256, 256
    x3 = jax.random.normal(k_x3, (b3, s3, h3), dtype=jnp.float32).astype(jnp.bfloat16)
    bound3 = 1.0 / jnp.sqrt(h3)
    w_B3 = jax.random.uniform(k_wb, (h3,), minval=-bound3, maxval=bound3,
                              dtype=jnp.float32).astype(jnp.bfloat16)
    w_E3 = jax.random.uniform(k_we, (h3,), minval=-bound3, maxval=bound3,
                              dtype=jnp.float32).astype(jnp.bfloat16)

    s_B3, s_E3 = locate_entity_forward(x3, w_B3, b_B, w_E3, b_E)
    jax.block_until_ready((s_B3, s_E3))
    ref_B3, ref_E3 = _reference(x3, w_B3, b_B, w_E3, b_E)
    assert jnp.allclose(s_B3, ref_B3, atol=2e-2, rtol=2e-2)
    assert jnp.allclose(s_E3, ref_E3, atol=2e-2, rtol=2e-2)

    print("KERNEL_OK")
</pallas_src>

<mosaic_0001>
module attributes {stable_mosaic.version = 11 : i64} {
  func.func @_locate_entity_kernel(%arg0: i32, %arg1: memref<16x32xf32, #tpu.memory_space<vmem>>, %arg2: memref<32x2xf32, #tpu.memory_space<vmem>>, %arg3: memref<1x2xf32, #tpu.memory_space<vmem>>, %arg4: memref<2x16xf32, #tpu.memory_space<vmem>>) attributes {dimension_semantics = [#tpu.dimension_semantics<parallel>], iteration_bounds = array<i64: 1>, scalar_prefetch = 0 : i64, scratch_operands = 0 : i64, tpu.core_type = #tpu.core_type<tc>, window_params = [{transform_indices = @transform_0, window_bounds = array<i64: 16, 32>}, {pipeline_mode = #tpu.pipeline_mode<synchronous>, transform_indices = @transform_1, window_bounds = array<i64: 32, 2>}, {pipeline_mode = #tpu.pipeline_mode<synchronous>, transform_indices = @transform_2, window_bounds = array<i64: 1, 2>}, {transform_indices = @transform_3, window_bounds = array<i64: 2, 16>}]} {
    %c0 = arith.constant 0 : index
    %c0_0 = arith.constant 0 : index
    %0 = vector.load %arg1[%c0, %c0_0] : memref<16x32xf32, #tpu.memory_space<vmem>>, vector<16x32xf32>
    %c0_1 = arith.constant 0 : index
    %c0_2 = arith.constant 0 : index
    %1 = vector.load %arg2[%c0_1, %c0_2] : memref<32x2xf32, #tpu.memory_space<vmem>>, vector<32x2xf32>
    %cst = arith.constant dense<0.000000e+00> : vector<16x2xf32>
    %2 = tpu.matmul %0, %1, %cst {dimension_numbers = #tpu.dot_dimension_numbers<[1], [0], [0], [1], [0, 0, 1, 1], [], []>} : vector<16x32xf32>, vector<32x2xf32>, vector<16x2xf32> -> vector<16x2xf32>
    %c0_3 = arith.constant 0 : index
    %c0_4 = arith.constant 0 : index
    %3 = vector.load %arg3[%c0_3, %c0_4] : memref<1x2xf32, #tpu.memory_space<vmem>>, vector<1x2xf32>
    %4 = vector.broadcast %3 : vector<1x2xf32> to vector<16x2xf32>
    %5 = arith.addf %2, %4 : vector<16x2xf32>
    %6 = tpu.transpose %5, [1, 0] : vector<16x2xf32> -> vector<2x16xf32>
    %c0_5 = arith.constant 0 : index
    %c0_6 = arith.constant 0 : index
    %7 = vector.load %arg4[%c0_5, %c0_6] : memref<2x16xf32, #tpu.memory_space<vmem>>, vector<2x16xf32>
    tpu.vector_store %arg4[%c0_5, %c0_6], %6 {strides = array<i32>} : memref<2x16xf32, #tpu.memory_space<vmem>>, vector<2x16xf32>,
    return
  }
  func.func @transform_0(%arg0: i32) -> (i32, i32) {
    %c0_i32 = arith.constant 0 : i32
    %c0_i32_0 = arith.constant 0 : i32
    return %arg0, %c0_i32 : i32, i32
  }
  func.func @transform_1(%arg0: i32) -> (i32, i32) {
    %c0_i32 = arith.constant 0 : i32
    %c0_i32_0 = arith.constant 0 : i32
    %c0_i32_1 = arith.constant 0 : i32
    return %c0_i32, %c0_i32_0 : i32, i32
  }
  func.func @transform_2(%arg0: i32) -> (i32, i32) {
    %c0_i32 = arith.constant 0 : i32
    %c0_i32_0 = arith.constant 0 : i32
    %c0_i32_1 = arith.constant 0 : i32
    return %c0_i32, %c0_i32_0 : i32, i32
  }
  func.func @transform_3(%arg0: i32) -> (i32, i32) {
    %c0_i32 = arith.constant 0 : i32
    %c0_i32_0 = arith.constant 0 : i32
    return %c0_i32, %arg0 : i32, i32
  }
}

</mosaic_0001>

<bundles_post_ra>
// kernel: tpu_custom_call.1
= control target key start
LH: loop header
LB: loop body
LE: loop exit
PB: predicated region body
PF: predicated region fallthrough
CT: control target
= control target key end

     0   :  { %vm28_vm0 = vcmask 261120   ;;  %s266_s0 = inlined_call_operand.vmem [shape: f32[16,32], index: 0, kind: input, shape index: {}]   ;;  %s267_s1 = inlined_call_operand.vmem [shape: f32[32,2], index: 1, kind: input, shape index: {}]   ;;  %s268_s2 = inlined_call_operand.vmem [shape: f32[1,2], index: 2, kind: input, shape index: {}]   ;;  %s269_s3 = inlined_call_operand.hbm [shape: f32[2,16], index: 3, kind: output, shape index: {}]  }
   0x1   :  { %v17_v0 = vld [vmem:[%s267_s1] sm:$0xff]  ;;  %v18_v1 = vld [vmem:[%s267_s1 + $0x8] sm:$0xff]  ;;  %v19_v2 = vld [vmem:[%s267_s1 + $0x10] sm:$0xff] }
   0x2   :  { %v178_v3 = vpack.c.bf16 %v18_v1, %v17_v0  ;;  %v20_v4 = vld [vmem:[%s267_s1 + $0x18] sm:$0xff]  ;;  %v15_v5 = vld [vmem:[%s266_s0] sm:$0xff] }
   0x3   :  { %v182_v6 = vpack.c.bf16 %v20_v4, %v19_v2  ;;  %175 = vmatprep.mubr.msk.f32.mxu0 %vm28_vm0, %v15_v5 }
   0x4   :  { %8 = vsyncpa [#allocation3], 0  ;;  %179 = vmatprep.subr.bf16.mxu0 %v178_v3  ;;  %v16_v7 = vld [vmem:[%s266_s0 + $0x8] sm:$0xff]  ;;  %v158_v8 = vld [vmem:[%s268_s2] ss:$0 sm:$0xff]  ;;  %s212_s1 = smov [#allocation2]  }
   0x5   :  { %181 = vmatpush3.bf16.msra.mxu0 %v178_v3  ;;  %s150_s26 = sshll.u32 %s212_s1, 4  ;;  %vm142_vm1 = vcmask 123904   ;;  %s151_s26 = int_to_ptr.vmem [resolvable:$true] %s150_s26 }
   0x6   :  { %183 = vmatprep.subr.bf16.mxu0 %v182_v6  ;;  %s188_s27 = scalar_lea.vmem %s151_s26, 32  ;;  %p193_p1 = scmp.lt.s32.totalorder %s151_s26, %s151_s26 }
   0x7   :  { %p189_p0 = scmp.ne.s32.totalorder %s151_s26, %s188_s27  ;;  %p194_p2 = scmp.lt.s32.totalorder %s188_s27, %s188_s27 }
   0x9   :  { %185 = vmatpush3.bf16.msra.mxu0 %v182_v6  ;;  %p195_p3 = por %p194_p2, %p193_p1 }
   0xb   :  { %p196_p4 = pnand %p195_p3, %p189_p0 }
   0xc   :  { %176 = vmatmul.mubr.msk.f32.vlgmr.msra.gmra.mrb[0].mxu0 %vm28_vm0, %v16_v7 }
  0xdf   :  { %v177_v9 = vpop.f32.mrb[0].mxu0 }
  0xe0   :  { %v101_v10 = vpop.f32.mrb[1].mxu0  ;;  %v107_v12 = vadd.f32 %v177_v9, %v158_v8 }
  0xe1   :  { %v102_v11 = vadd.f32 %v158_v8, %v101_v10 }
  0xe3   :  { %110 = vxpose.xlu0.b32.start [1/2] (short) (narrow) %v102_v11, 8 }
  0xe7   :  { %111 = vxpose.xlu0.b32.end [2/2] (short) (narrow) %v107_v12, 8 }
 0x163   :  { %v126_v13 = vpop.trf.xlu0 }
 0x164   :  { %143 = vst.msk [vmem:[#allocation2] sm:$0x3] %vm142_vm1, %v126_v13 }
 0x165   :  { %199 = shalt.err (!%p196_p4)
}
 0x166   :  { %s200_s28 = scalar_lea.hbm %s269_s3, 32 }
 0x167   :  { %p201_p5 = scmp.ne.s32.totalorder %s269_s3, %s200_s28  ;;  %p204_p6 = scmp.lt.u32.totalorder %s200_s28, %s269_s3 }
 0x169   :  { %p206_p7 = pnand %p204_p6, %p201_p5 }
 0x16b   :  { %209 = shalt.err (!%p206_p7)
}
 0x16c   :  { %153 = dma.vmem_to_hbm [thread:$0]  %s151_s26, 32, %s269_s3, [#allocation3]  }
 0x16d   :  { %210 = dma.done.wait [#allocation3], 32  }
 0x16e   :  { %211 = vsyncadd [#allocation3], 4294967264 }
 0x16f   :  { %157 = vsyncpa [#allocation3], 1 }

</bundles_post_ra>
